<compile_context>
chip_gen: v5e
topology: v5e:2x2
jax: 0.10.0
libtpu: 0.0.40
codegen_flags: <defaults>
</compile_context>

<pallas_src>
import functools

import jax
import jax.numpy as jnp
from jax import lax
from jax.experimental import pallas as pl
from jax.experimental.pallas import tpu as pltpu

LANES = 128


def _round_up(x, m):
    return ((x + m - 1) // m) * m


def _pad_last(a, mult):
    n = a.shape[-1]
    n_pad = _round_up(n, mult)
    if n_pad == n:
        return a
    pad = [(0, 0)] * (a.ndim - 1) + [(0, n_pad - n)]
    return jnp.pad(a, pad)


# ----------------------------------------------------------------------------
# Pallas kernel: fused matmul + bias (+ optional ReLU)
# ----------------------------------------------------------------------------
def _matmul_bias_kernel(x_ref, w_ref, b_ref, o_ref, *, apply_relu: bool):
    # bf16 x bf16 -> f32 on the MXU; epilogue stays f32 on the VPU.
    y = jnp.dot(x_ref[...], w_ref[...], preferred_element_type=jnp.float32)
    y = y + b_ref[...]                      # (1, Npad) broadcasts over rows
    if apply_relu:
        y = jnp.maximum(y, 0.0)
    o_ref[...] = y.astype(o_ref.dtype)


def pallas_matmul_bias(x, w_packed, b_packed, *, apply_relu, n_valid,
                       out_dtype=jnp.float32, tm=512):
    """y = relu?(x @ w_packed + b_packed)[:, :n_valid], compute in Pallas.

    x:        (M, K)    any float dtype (cast to bf16 for the MXU)
    w_packed: (K, Npad) bf16, Npad a multiple of 128 (lane-dense stores)
    b_packed: (1, Npad) f32
    """
    M, K = x.shape
    K2, Npad = w_packed.shape
    assert K == K2 and Npad % LANES == 0

    # Tile M; keep the tile a multiple of 8 sublanes and pad M up to a multiple
    # of the tile (zero rows, sliced off afterwards).
    tm = min(tm, _round_up(M, 8))
    m_pad = _round_up(M, tm)
    x = x.astype(jnp.bfloat16)
    if m_pad != M:
        x = jnp.pad(x, ((0, m_pad - M), (0, 0)))

    kernel = functools.partial(_matmul_bias_kernel, apply_relu=apply_relu)
    y = pl.pallas_call(
        kernel,
        out_shape=jax.ShapeDtypeStruct((m_pad, Npad), out_dtype),
        grid=(m_pad // tm,),
        in_specs=[
            pl.BlockSpec((tm, K), lambda i: (i, 0)),       # x tile, pipelined
            pl.BlockSpec((K, Npad), lambda i: (0, 0)),     # weights resident
            pl.BlockSpec((1, Npad), lambda i: (0, 0)),     # bias resident
        ],
        out_specs=pl.BlockSpec((tm, Npad), lambda i: (i, 0)),
        compiler_params=pltpu.CompilerParams(
            dimension_semantics=("parallel",),
            vmem_limit_bytes=32 * 1024 * 1024,
        ),
    )(x, w_packed, b_packed)
    return y[:M, :n_valid]


# ----------------------------------------------------------------------------
# Glue: im2col for a 3x3 / stride-2 / VALID conv on an NHWC tensor (bf16)
# ----------------------------------------------------------------------------
def _im2col_3x3_s2(x_nhwc):
    B, H, W, C = x_nhwc.shape
    Ho = (H - 3) // 2 + 1
    Wo = (W - 3) // 2 + 1
    cols = []
    for ki in range(3):
        for kj in range(3):
            cols.append(x_nhwc[:, ki:ki + 2 * Ho:2, kj:kj + 2 * Wo:2, :])
    # (B, Ho, Wo, 9, C) with tap-major ordering (ki, kj, ci)
    patches = jnp.stack(cols, axis=3)
    return patches.reshape(B * Ho * Wo, 9 * C), Ho, Wo


def _conv3x3_s2_relu(x_nhwc, w_packed, b_packed, cout):
    B = x_nhwc.shape[0]
    patches, Ho, Wo = _im2col_3x3_s2(x_nhwc.astype(jnp.bfloat16))
    y = pallas_matmul_bias(patches, w_packed, b_packed, apply_relu=True,
                           n_valid=cout, out_dtype=jnp.bfloat16)
    return y.reshape(B, Ho, Wo, cout)


# ----------------------------------------------------------------------------
# One-time weight packing (hoisted out of the forward pass)
# ----------------------------------------------------------------------------
def pack_params(params, idim, odim):
    f3 = ((((idim - 1) // 2) - 1) // 2 - 1) // 2

    def pack_conv(w):                       # (Cout, Cin, 3, 3) -> (9*Cin, Npad) bf16
        cout = w.shape[0]
        wf = jnp.transpose(w, (2, 3, 1, 0)).reshape(-1, cout)   # (ki,kj,ci) rows
        return _pad_last(wf, LANES).astype(jnp.bfloat16)

    def pack_bias(b):                       # (Cout,) -> (1, Npad) f32
        return _pad_last(b.reshape(1, -1).astype(jnp.float32), LANES)

    # PyTorch Linear weight is (odim, C*F) with column index c*F + f (NCHW
    # flatten). Reorder rows to f*C + c so the NHWC conv output can be flattened
    # directly (no activation transpose before the Linear).
    wl = params["w_lin"].reshape(odim, odim, f3)                 # [o, c, f]
    wl = jnp.transpose(wl, (2, 1, 0)).reshape(f3 * odim, odim)   # [f*C + c, o]

    return {
        "w1": pack_conv(params["w1"]), "b1": pack_bias(params["b1"]),
        "w2": pack_conv(params["w2"]), "b2": pack_bias(params["b2"]),
        "w3": pack_conv(params["w3"]), "b3": pack_bias(params["b3"]),
        "w_lin": _pad_last(wl, LANES).astype(jnp.bfloat16),
        "b_lin": pack_bias(params["b_lin"]),
        "odim": odim,
    }


# ----------------------------------------------------------------------------
# Conv2dSubsampling8 forward
# ----------------------------------------------------------------------------
def conv2d_subsampling8_forward(x, x_mask, packed):
    """x: (B, T, idim), x_mask: (B, 1, T) bool or None."""
    odim = packed["odim"]
    h = x[:, :, :, None].astype(jnp.bfloat16)          # NHWC, C=1

    h = _conv3x3_s2_relu(h, packed["w1"], packed["b1"], odim)
    h = _conv3x3_s2_relu(h, packed["w2"], packed["b2"], odim)
    h = _conv3x3_s2_relu(h, packed["w3"], packed["b3"], odim)

    B, Tp, Fp, C = h.shape
    # NHWC flatten (F-major) matches the pre-permuted w_lin -> no transpose.
    h2 = h.reshape(B * Tp, Fp * C)
    y = pallas_matmul_bias(h2, packed["w_lin"], packed["b_lin"],
                           apply_relu=False, n_valid=odim, out_dtype=jnp.float32)
    y = y.reshape(B, Tp, odim)

    if x_mask is None:
        return y, None
    m = x_mask[:, :, :-2:2][:, :, :-2:2][:, :, :-2:2]
    return y, m


# ----------------------------------------------------------------------------
# Pure-JAX f32 reference (for correctness check)
# ----------------------------------------------------------------------------
def reference_forward(x, x_mask, params):
    h = x[:, None, :, :].astype(jnp.float32)  # NCHW
    for wk, bk in (("w1", "b1"), ("w2", "b2"), ("w3", "b3")):
        h = lax.conv_general_dilated(
            h, params[wk], window_strides=(2, 2), padding="VALID",
            dimension_numbers=("NCHW", "OIHW", "NCHW"))
        h = jnp.maximum(h + params[bk][None, :, None, None], 0.0)
    b, c, t, f = h.shape
    h = jnp.transpose(h, (0, 2, 1, 3)).reshape(b, t, c * f)
    y = h @ params["w_lin"].T + params["b_lin"]
    if x_mask is None:
        return y, None
    m = x_mask[:, :, :-2:2][:, :, :-2:2][:, :, :-2:2]
    return y, m


# ----------------------------------------------------------------------------
# Main
# ----------------------------------------------------------------------------
if __name__ == "__main__":
    # Small, module-consistent shapes.
    B, T, idim, odim = 2, 64, 40, 16
    F3 = ((((idim - 1) // 2) - 1) // 2 - 1) // 2  # freq dim after 3 convs -> 4

    key = jax.random.PRNGKey(0)
    keys = jax.random.split(key, 10)

    params = {
        "w1": 0.1 * jax.random.normal(keys[0], (odim, 1, 3, 3), jnp.float32),
        "b1": 0.1 * jax.random.normal(keys[1], (odim,), jnp.float32),
        "w2": 0.1 * jax.random.normal(keys[2], (odim, odim, 3, 3), jnp.float32),
        "b2": 0.1 * jax.random.normal(keys[3], (odim,), jnp.float32),
        "w3": 0.1 * jax.random.normal(keys[4], (odim, odim, 3, 3), jnp.float32),
        "b3": 0.1 * jax.random.normal(keys[5], (odim,), jnp.float32),
        "w_lin": 0.1 * jax.random.normal(keys[6], (odim, odim * F3), jnp.float32),
        "b_lin": 0.1 * jax.random.normal(keys[7], (odim,), jnp.float32),
    }

    x = jax.random.normal(keys[8], (B, T, idim), jnp.float32)
    x_mask = jnp.ones((B, 1, T), dtype=bool)

    packed = pack_params(params, idim, odim)   # one-time weight packing

    y, m = conv2d_subsampling8_forward(x, x_mask, packed)
    y = jax.block_until_ready(y)
    m = jax.block_until_ready(m)

    y_ref, m_ref = reference_forward(x, x_mask, params)

    Tp = (((T - 1) // 2 - 1) // 2 - 1) // 2
    assert y.shape == (B, Tp, odim), y.shape
    assert m.shape == (B, 1, Tp), m.shape
    # bf16 MXU operands + bf16 conv intermediates vs f32 reference -> loosened tol.
    max_err = float(jnp.max(jnp.abs(y - y_ref)))
    assert jnp.allclose(y, y_ref, rtol=5e-2, atol=5e-2), f"mismatch, max abs err {max_err}"
    assert jnp.array_equal(m, m_ref), "mask subsampling mismatch"

    print("KERNEL_OK")
</pallas_src>

<mosaic_0001>
module attributes {stable_mosaic.version = 11 : i64} {
  func.func @_matmul_bias_kernel(%arg0: i32, %arg1: memref<512x9xbf16, #tpu.memory_space<vmem>>, %arg2: memref<9x128xbf16, #tpu.memory_space<vmem>>, %arg3: memref<1x128xf32, #tpu.memory_space<vmem>>, %arg4: memref<512x128xbf16, #tpu.memory_space<vmem>>) attributes {dimension_semantics = [#tpu.dimension_semantics<parallel>], iteration_bounds = array<i64: 3>, scalar_prefetch = 0 : i64, scratch_operands = 0 : i64, tpu.core_type = #tpu.core_type<tc>, window_params = [{transform_indices = @transform_0, window_bounds = array<i64: 512, 9>}, {pipeline_mode = #tpu.pipeline_mode<synchronous>, transform_indices = @transform_1, window_bounds = array<i64: 9, 128>}, {pipeline_mode = #tpu.pipeline_mode<synchronous>, transform_indices = @transform_2, window_bounds = array<i64: 1, 128>}, {transform_indices = @transform_3, window_bounds = array<i64: 512, 128>}]} {
    %c0 = arith.constant 0 : index
    %c0_0 = arith.constant 0 : index
    %0 = vector.load %arg1[%c0, %c0_0] : memref<512x9xbf16, #tpu.memory_space<vmem>>, vector<512x9xbf16>
    %c0_1 = arith.constant 0 : index
    %c0_2 = arith.constant 0 : index
    %1 = vector.load %arg2[%c0_1, %c0_2] : memref<9x128xbf16, #tpu.memory_space<vmem>>, vector<9x128xbf16>
    %cst = arith.constant dense<0.000000e+00> : vector<512x128xf32>
    %2 = tpu.matmul %0, %1, %cst {dimension_numbers = #tpu.dot_dimension_numbers<[1], [0], [0], [1], [0, 0, 1, 1], [], []>} : vector<512x9xbf16>, vector<9x128xbf16>, vector<512x128xf32> -> vector<512x128xf32>
    %c0_3 = arith.constant 0 : index
    %c0_4 = arith.constant 0 : index
    %3 = vector.load %arg3[%c0_3, %c0_4] : memref<1x128xf32, #tpu.memory_space<vmem>>, vector<1x128xf32>
    %4 = vector.broadcast %3 : vector<1x128xf32> to vector<512x128xf32>
    %5 = arith.addf %2, %4 : vector<512x128xf32>
    %cst_5 = arith.constant 0.000000e+00 : f32
    %6 = vector.broadcast %cst_5 : f32 to vector<512x128xf32>
    %7 = arith.maximumf %5, %6 : vector<512x128xf32>
    %8 = arith.truncf %7 : vector<512x128xf32> to vector<512x128xbf16>
    %c0_6 = arith.constant 0 : index
    %c0_7 = arith.constant 0 : index
    %9 = vector.load %arg4[%c0_6, %c0_7] : memref<512x128xbf16, #tpu.memory_space<vmem>>, vector<512x128xbf16>
    tpu.vector_store %arg4[%c0_6, %c0_7], %8 {strides = array<i32>} : memref<512x128xbf16, #tpu.memory_space<vmem>>, vector<512x128xbf16>,
    return
  }
  func.func @transform_0(%arg0: i32) -> (i32, i32) {
    %c0_i32 = arith.constant 0 : i32
    %c0_i32_0 = arith.constant 0 : i32
    return %arg0, %c0_i32 : i32, i32
  }
  func.func @transform_1(%arg0: i32) -> (i32, i32) {
    %c0_i32 = arith.constant 0 : i32
    %c0_i32_0 = arith.constant 0 : i32
    %c0_i32_1 = arith.constant 0 : i32
    return %c0_i32, %c0_i32_0 : i32, i32
  }
  func.func @transform_2(%arg0: i32) -> (i32, i32) {
    %c0_i32 = arith.constant 0 : i32
    %c0_i32_0 = arith.constant 0 : i32
    %c0_i32_1 = arith.constant 0 : i32
    return %c0_i32, %c0_i32_0 : i32, i32
  }
  func.func @transform_3(%arg0: i32) -> (i32, i32) {
    %c0_i32 = arith.constant 0 : i32
    %c0_i32_0 = arith.constant 0 : i32
    return %arg0, %c0_i32 : i32, i32
  }
}

</mosaic_0001>

<bundles_post_ra>
// kernel: tpu_custom_call.1
= control target key start
LH: loop header
LB: loop body
LE: loop exit
PB: predicated region body
PF: predicated region fallthrough
CT: control target
= control target key end

     0   :  { %8 = vsyncpa [#allocation3], 0  ;;  %s1749_s0 = inlined_call_operand.vmem [shape: bf16[1536,9], index: 0, kind: input, shape index: {}]   ;;  %s1750_s1 = inlined_call_operand.vmem [shape: bf16[9,128], index: 1, kind: input, shape index: {}]   ;;  %s1751_s2 = inlined_call_operand.vmem [shape: f32[1,128], index: 2, kind: input, shape index: {}]   ;;  %s1752_s3 = inlined_call_operand.hbm [shape: bf16[1536,128], index: 3, kind: output, shape index: {}]  }
   0x1   :  { %10 = vsyncpa [#allocation3 + $0x1], 0  ;;  %s1485_s12 = smov 0   ;;  %s1487_s13 = smov 0  }
   0x2   :  { %s1489_s14 = smov 0   ;;  %s1491_s15 = smov 0  }
   0x3 LB: > { %s1506_s16 = sadd.s32 4294967295, %s1460_s15   ;;  %s951_s17 = sadd.s32 4294967294, %s1460_s15   ;;  %s1460_s15 = sphi %s1491_s15, %s1758_s15   ;;  %s1456_s14 = sphi %s1489_s14, %s1757_s14   ;;  %s1452_s13 = sphi %s1487_s13, %s1756_s13   ;;  %s1448_s12 = sphi %s1485_s12, %s1755_s12  }
   0x4   : > { %s1510_s18 = sadd.s32 1, %s1460_s15   ;;  %s91_s19 = sadd.s32 1, %s1456_s14 }
   0x5   : > { %s88_s20 = ssub.s32 %s1460_s15, %s1510_s18  ;;  %p101_p0 = scmp.ne.s32.totalorder %s1456_s14, %s1452_s13 }
   0x6   : > { %p89_p1 = scmp.eq.s32.totalorder %s88_s20, 0  ;;  %p102_p2 = scmp.eq.s32.totalorder %s1506_s16, 2 }
   0x7   : > { %p107_p3 = scmp.ne.s32.totalorder %s1452_s13, %s1448_s12  ;;  %p108_p4 = scmp.eq.s32.totalorder %s951_s17, 2 }
   0x8   : > { %s1521_s21 = scalar_select %p89_p1, %s1456_s14, %s91_s19  }
   0x9   : > { %p1523_p5 = por %p102_p2, %p101_p0  ;;  %p1527_p6 = por %p108_p4, %p107_p3 }
   0xa   : > { %p954_p7 = scmp.ge.s32.totalorder %s1460_s15, 1  ;;  %p141_p8 = scmp.lt.s32.totalorder %s1460_s15, 4 }
   0xc   : > { %p142_p9 = pnand %p954_p7, %p141_p8 }
   0xd   : > { %s956_s28 = sshll.u32 (!%p142_p9), %s1506_s16, 6  ;;  %s162_s8 = sand.u32 (!%p142_p9), 1, %s1452_s13  }
   0xe   : > { %145 = sbr.rel (%p142_p9) target bundleno = 292 (0x124), region = 32  ;;  %p166_p10 = scmp.lt.s32.totalorder (!%p142_p9), %s956_s28, 191 }
   0xf   : > { %s955_s9 = sshll.u32 (!%p142_p9), %s162_s8, 8  ;;  %s1160_s11 = sshll.u32 (!%p142_p9), %s1506_s16, 8 }
  0x10   : > { %s1623_s10 = scalar_lea.vmem (!%p142_p9), [#allocation2], %s955_s9  ;;  %s885_s20 = scalar_lea.hbm (!%p142_p9), %s1752_s3, %s1160_s11 }
  0x11   : > { %s886_s16 = sshll.u32 (!%p142_p9), %s1623_s10, 4  ;;  %s888_s24 = sshll.u32 (!%p142_p9), %s885_s20, 4  ;;  %s887_s16 = int_to_ptr.vmem [resolvable:$true] %s886_s16  ;;  %s889_s24 = int_to_ptr.hbm [resolvable:$true] %s888_s24 }
  0x12   : > { %s874_s25 = scalar_lea.sflag (!%p142_p9), [#allocation3], %s162_s8  ;;  %s1412_s26 = sshra.s32 (!%p142_p9), %s889_s24, 4  ;;  %s1413_s26 = int_to_ptr.hbm [resolvable:$true] %s1412_s26 }
  0x13   : > { %v1088_v0 = vld [vmem:[%s1750_s1] sm:$0xf]  ;;  %v1159_v1 = vld [vmem:[%s1750_s1] sm:$0x10]  ;;  %vm505_vm0 = vcmask 1043456   ;;  %vm506_vm1 = vcmask 1044480   ;;  %p1419_p0 = scmp.lt.s32.totalorder %s1413_s26, %s1752_s3 }
  0x14   : > { %v1089_v2 = vor.u32 %v1159_v1, %v1088_v0  ;;  %v1462_v3 = vmov 65535   ;;  %s1760_s28 = smov (!%p166_p10, %s956_s28), 191  ;;  %vm408_vm2 = vcmask 72704   ;;  %v1612_v41 = vld [vmem:[%s1751_s2] ss:$0 sm:$0xff]  ;;  %s1414_s27 = scalar_lea.hbm %s1413_s26, 256 }
  0x15   : > { %v507_v4 = vsel %vm505_vm0, 4294967295, %v1462_v3  ;;  %s957_s29 = sshll.u32 %s1760_s28, 2  ;;  %p1415_p11 = scmp.ne.s32.totalorder %s1413_s26, %s1414_s27 }
  0x16   : > { %v508_v5 = vsel %vm506_vm1, %v507_v4, 0  ;;  %s1543_s5 = scalar_lea.vmem %s1749_s0, %s957_s29  ;;  %s1418_s30 = scalar_lea.hbm %s1752_s3, 768 }
  0x17   : > { %v510_v6 = vand.u32 %v1089_v2, %v508_v5  ;;  %v1127_v7 = vld [vmem:[%s1543_s5] sm:$0xff]  ;;  %v1128_v11 = vld [vmem:[%s1543_s5 + $0x8] sm:$0xff]  ;;  %v1129_v15 = vld [vmem:[%s1543_s5 + $0x10] sm:$0xff]  ;;  %p1416_p12 = pnand %p1415_p11, %p1523_p5  ;;  %p1420_p1 = scmp.lt.s32.totalorder %s1418_s30, %s1414_s27 }
  0x18   : > { %v1135_v8 = vld [vmem:[%s1543_s5 + $0x40] sm:$0xff]  ;;  %v1136_v12 = vld [vmem:[%s1543_s5 + $0x48] sm:$0xff]  ;;  %v1137_v16 = vld [vmem:[%s1543_s5 + $0x50] sm:$0xff] }
  0x19   : > { %519 = vmatpush.bf16.msra.mxu0 %v510_v6  ;;  %1352 = vmatpush.bf16.msra.mxu1 %v510_v6  ;;  %v1143_v9 = vld [vmem:[%s1543_s5 + $0x80] sm:$0xff]  ;;  %v1144_v13 = vld [vmem:[%s1543_s5 + $0x88] sm:$0xff]  ;;  %v1145_v17 = vld [vmem:[%s1543_s5 + $0x90] sm:$0xff]  ;;  %p1417_p13 = pneg %p1416_p12  ;;  %p1421_p2 = por %p1420_p1, %p1419_p0 }
  0x1a   : > { %1353 = vmatpush.bf16.msra.mxu2 %v510_v6  ;;  %1354 = vmatpush.bf16.msra.mxu3 %v510_v6  ;;  %v1151_v10 = vld [vmem:[%s1543_s5 + $0xc0] sm:$0xff]  ;;  %v1152_v14 = vld [vmem:[%s1543_s5 + $0xc8] sm:$0xff]  ;;  %v1153_v18 = vld [vmem:[%s1543_s5 + $0xd0] sm:$0xff] }
  0x1b   : > { %v1130_v19 = vld [vmem:[%s1543_s5 + $0x18] sm:$0xff]  ;;  %v1131_v23 = vld [vmem:[%s1543_s5 + $0x20] sm:$0xff]  ;;  %v1132_v27 = vld [vmem:[%s1543_s5 + $0x28] sm:$0xff]  ;;  %p1422_p3 = pnand %p1421_p2, %p1417_p13 }
  0x1c   : > { %1090 = vmatmul.msk.bf16.vlgmr.msra.gmra.mxu0 %vm408_vm2, %v1127_v7  ;;  %1098 = vmatmul.msk.bf16.vlgmr.msra.gmra.mxu1 %vm408_vm2, %v1135_v8  ;;  %v1138_v20 = vld [vmem:[%s1543_s5 + $0x58] sm:$0xff]  ;;  %v1139_v24 = vld [vmem:[%s1543_s5 + $0x60] sm:$0xff]  ;;  %v1140_v28 = vld [vmem:[%s1543_s5 + $0x68] sm:$0xff] }
  0x1d   : > { %1106 = vmatmul.msk.bf16.vlgmr.msra.gmra.mxu2 %vm408_vm2, %v1143_v9  ;;  %1114 = vmatmul.msk.bf16.vlgmr.msra.gmra.mxu3 %vm408_vm2, %v1151_v10  ;;  %v1146_v21 = vld [vmem:[%s1543_s5 + $0x98] sm:$0xff]  ;;  %v1147_v25 = vld [vmem:[%s1543_s5 + $0xa0] sm:$0xff]  ;;  %v1148_v29 = vld [vmem:[%s1543_s5 + $0xa8] sm:$0xff] }
  0x1e   : > { %v1154_v22 = vld [vmem:[%s1543_s5 + $0xd8] sm:$0xff]  ;;  %v1155_v26 = vld [vmem:[%s1543_s5 + $0xe0] sm:$0xff]  ;;  %v1156_v30 = vld [vmem:[%s1543_s5 + $0xe8] sm:$0xff] }
  0x1f   : > { %v1133_v31 = vld [vmem:[%s1543_s5 + $0x30] sm:$0xff]  ;;  %v1134_v35 = vld [vmem:[%s1543_s5 + $0x38] sm:$0xff] }
  0x20   : > { %v1141_v32 = vld [vmem:[%s1543_s5 + $0x70] sm:$0xff]  ;;  %v1142_v36 = vld [vmem:[%s1543_s5 + $0x78] sm:$0xff] }
  0x21   : > { %v1149_v33 = vld [vmem:[%s1543_s5 + $0xb0] sm:$0xff]  ;;  %v1150_v37 = vld [vmem:[%s1543_s5 + $0xb8] sm:$0xff] }
  0x22   : > { %v1157_v34 = vld [vmem:[%s1543_s5 + $0xf0] sm:$0xff]  ;;  %v1158_v38 = vld [vmem:[%s1543_s5 + $0xf8] sm:$0xff] }
  0x2c   : > { %1091 = vmatmul.msk.bf16.gmra.mxu0 %vm408_vm2, %v1128_v11  ;;  %1099 = vmatmul.msk.bf16.gmra.mxu1 %vm408_vm2, %v1136_v12 }
  0x2d   : > { %1107 = vmatmul.msk.bf16.gmra.mxu2 %vm408_vm2, %v1144_v13  ;;  %1115 = vmatmul.msk.bf16.gmra.mxu3 %vm408_vm2, %v1152_v14 }
  0x3c   : > { %1092 = vmatmul.msk.bf16.gmra.mxu0 %vm408_vm2, %v1129_v15  ;;  %1100 = vmatmul.msk.bf16.gmra.mxu1 %vm408_vm2, %v1137_v16 }
  0x3d   : > { %1108 = vmatmul.msk.bf16.gmra.mxu2 %vm408_vm2, %v1145_v17  ;;  %1116 = vmatmul.msk.bf16.gmra.mxu3 %vm408_vm2, %v1153_v18 }
  0x4c   : > { %1093 = vmatmul.msk.bf16.gmra.mxu0 %vm408_vm2, %v1130_v19  ;;  %1101 = vmatmul.msk.bf16.gmra.mxu1 %vm408_vm2, %v1138_v20 }
  0x4d   : > { %1109 = vmatmul.msk.bf16.gmra.mxu2 %vm408_vm2, %v1146_v21  ;;  %1117 = vmatmul.msk.bf16.gmra.mxu3 %vm408_vm2, %v1154_v22 }
  0x5c   : > { %1094 = vmatmul.msk.bf16.gmra.mxu0 %vm408_vm2, %v1131_v23  ;;  %1102 = vmatmul.msk.bf16.gmra.mxu1 %vm408_vm2, %v1139_v24 }
  0x5d   : > { %1110 = vmatmul.msk.bf16.gmra.mxu2 %vm408_vm2, %v1147_v25  ;;  %1118 = vmatmul.msk.bf16.gmra.mxu3 %vm408_vm2, %v1155_v26 }
  0x6c   : > { %1095 = vmatmul.msk.bf16.gmra.mxu0 %vm408_vm2, %v1132_v27  ;;  %1103 = vmatmul.msk.bf16.gmra.mxu1 %vm408_vm2, %v1140_v28 }
  0x6d   : > { %1111 = vmatmul.msk.bf16.gmra.mxu2 %vm408_vm2, %v1148_v29  ;;  %1119 = vmatmul.msk.bf16.gmra.mxu3 %vm408_vm2, %v1156_v30 }
  0x7c   : > { %1096 = vmatmul.msk.bf16.gmra.mxu0 %vm408_vm2, %v1133_v31  ;;  %1104 = vmatmul.msk.bf16.gmra.mxu1 %vm408_vm2, %v1141_v32 }
  0x7d   : > { %1112 = vmatmul.msk.bf16.gmra.mxu2 %vm408_vm2, %v1149_v33  ;;  %1120 = vmatmul.msk.bf16.gmra.mxu3 %vm408_vm2, %v1157_v34 }
  0x8c   : > { %1097 = vmatmul.msk.bf16.gmra.mxu0 %vm408_vm2, %v1134_v35  ;;  %1105 = vmatmul.msk.bf16.gmra.mxu1 %vm408_vm2, %v1142_v36 }
  0x8d   : > { %1113 = vmatmul.msk.bf16.gmra.mxu2 %vm408_vm2, %v1150_v37  ;;  %1121 = vmatmul.msk.bf16.gmra.mxu3 %vm408_vm2, %v1158_v38 }
  0x99   : > { %v521_v39 = vpop.f32.mrf.mxu0  ;;  %v561_v40 = vpop.f32.mrf.mxu1 }
  0x9a   : > { %v522_v42 = vadd.f32 %v1612_v41, %v521_v39  ;;  %v562_v43 = vadd.f32 %v1612_v41, %v561_v40 }
  0x9c   : > { %v681_v50 = vmax.f32 %v522_v42, 0.0  ;;  %v697_v51 = vmax.f32 %v562_v43, 0.0 }
  0xa0   : > { %v601_v44 = vpop.f32.mrf.mxu2  ;;  %v641_v45 = vpop.f32.mrf.mxu3 }
  0xa1   : > { %v523_v46 = vpop.f32.mrf.mxu0  ;;  %v563_v47 = vpop.f32.mrf.mxu1  ;;  %v602_v56 = vadd.f32 %v1612_v41, %v601_v44  ;;  %v642_v57 = vadd.f32 %v1612_v41, %v641_v45 }
  0xa2   : > { %v524_v48 = vadd.f32 %v1612_v41, %v523_v46  ;;  %v564_v49 = vadd.f32 %v1612_v41, %v563_v47 }
  0xa3   : > { %v713_v0 = vmax.f32 %v602_v56, 0.0  ;;  %v729_v1 = vmax.f32 %v642_v57, 0.0 }
  0xa4   : > { %v682_v52 = vmax.f32 %v524_v48, 0.0  ;;  %v698_v53 = vmax.f32 %v564_v49, 0.0 }
  0xa6   : > { %v1164_v54 = vpack.c.bf16 %v682_v52, %v681_v50  ;;  %v1204_v55 = vpack.c.bf16 %v698_v53, %v697_v51 }
  0xa8   : > { %1165 = vst [vmem:[%s1623_s10] sm:$0xff] %v1164_v54   ;;  %v603_v58 = vpop.f32.mrf.mxu2  ;;  %v643_v59 = vpop.f32.mrf.mxu3 }
  0xa9   : > { %1328 = vst [vmem:[%s1623_s10 + $0x40] sm:$0xff] %v1204_v55   ;;  %v604_v60 = vadd.f32 %v1612_v41, %v603_v58  ;;  %v644_v61 = vadd.f32 %v1612_v41, %v643_v59  ;;  %v526_v62 = vpop.f32.mrf.mxu0  ;;  %v566_v63 = vpop.f32.mrf.mxu1 }
  0xaa   : > { %v527_v6 = vadd.f32 %v1612_v41, %v526_v62  ;;  %v567_v7 = vadd.f32 %v1612_v41, %v566_v63 }
  0xab   : > { %v714_v2 = vmax.f32 %v604_v60, 0.0  ;;  %v730_v3 = vmax.f32 %v644_v61, 0.0 }
  0xac   : > { %v683_v14 = vmax.f32 %v527_v6, 0.0  ;;  %v699_v15 = vmax.f32 %v567_v7, 0.0 }
  0xad   : > { %v1244_v4 = vpack.c.bf16 %v714_v2, %v713_v0  ;;  %v1284_v5 = vpack.c.bf16 %v730_v3, %v729_v1 }
  0xaf   : > { %1336 = vst [vmem:[%s1623_s10 + $0x80] sm:$0xff] %v1244_v4  }
  0xb0   : > { %1344 = vst [vmem:[%s1623_s10 + $0xc0] sm:$0xff] %v1284_v5   ;;  %v606_v8 = vpop.f32.mrf.mxu2  ;;  %v646_v9 = vpop.f32.mrf.mxu3 }
  0xb1   : > { %v528_v10 = vpop.f32.mrf.mxu0  ;;  %v568_v11 = vpop.f32.mrf.mxu1  ;;  %v607_v20 = vadd.f32 %v1612_v41, %v606_v8  ;;  %v647_v21 = vadd.f32 %v1612_v41, %v646_v9 }
  0xb2   : > { %v529_v12 = vadd.f32 %v1612_v41, %v528_v10  ;;  %v569_v13 = vadd.f32 %v1612_v41, %v568_v11 }
  0xb3   : > { %v715_v28 = vmax.f32 %v607_v20, 0.0  ;;  %v731_v29 = vmax.f32 %v647_v21, 0.0 }
  0xb4   : > { %v684_v16 = vmax.f32 %v529_v12, 0.0  ;;  %v700_v17 = vmax.f32 %v569_v13, 0.0 }
  0xb6   : > { %v1169_v18 = vpack.c.bf16 %v684_v16, %v683_v14  ;;  %v1209_v19 = vpack.c.bf16 %v700_v17, %v699_v15 }
  0xb8   : > { %1321 = vst [vmem:[%s1623_s10 + $0x8] sm:$0xff] %v1169_v18   ;;  %v608_v22 = vpop.f32.mrf.mxu2  ;;  %v648_v23 = vpop.f32.mrf.mxu3 }
  0xb9   : > { %1329 = vst [vmem:[%s1623_s10 + $0x48] sm:$0xff] %v1209_v19   ;;  %v609_v24 = vadd.f32 %v1612_v41, %v608_v22  ;;  %v649_v25 = vadd.f32 %v1612_v41, %v648_v23  ;;  %v531_v26 = vpop.f32.mrf.mxu0  ;;  %v571_v27 = vpop.f32.mrf.mxu1 }
  0xba   : > { %v532_v34 = vadd.f32 %v1612_v41, %v531_v26  ;;  %v572_v35 = vadd.f32 %v1612_v41, %v571_v27 }
  0xbb   : > { %v716_v30 = vmax.f32 %v609_v24, 0.0  ;;  %v732_v31 = vmax.f32 %v649_v25, 0.0 }
  0xbc   : > { %v685_v43 = vmax.f32 %v532_v34, 0.0  ;;  %v701_v44 = vmax.f32 %v572_v35, 0.0 }
  0xbd   : > { %v1249_v32 = vpack.c.bf16 %v716_v30, %v715_v28  ;;  %v1289_v33 = vpack.c.bf16 %v732_v31, %v731_v29 }
  0xbf   : > { %1337 = vst [vmem:[%s1623_s10 + $0x88] sm:$0xff] %v1249_v32  }
  0xc0   : > { %1345 = vst [vmem:[%s1623_s10 + $0xc8] sm:$0xff] %v1289_v33   ;;  %v611_v36 = vpop.f32.mrf.mxu2  ;;  %v651_v37 = vpop.f32.mrf.mxu3 }
  0xc1   : > { %v533_v38 = vpop.f32.mrf.mxu0  ;;  %v573_v39 = vpop.f32.mrf.mxu1  ;;  %v612_v49 = vadd.f32 %v1612_v41, %v611_v36  ;;  %v652_v50 = vadd.f32 %v1612_v41, %v651_v37 }
  0xc2   : > { %v534_v40 = vadd.f32 %v1612_v41, %v533_v38  ;;  %v574_v42 = vadd.f32 %v1612_v41, %v573_v39 }
  0xc3   : > { %v717_v57 = vmax.f32 %v612_v49, 0.0  ;;  %v733_v58 = vmax.f32 %v652_v50, 0.0 }
  0xc4   : > { %v686_v45 = vmax.f32 %v534_v40, 0.0  ;;  %v702_v46 = vmax.f32 %v574_v42, 0.0 }
  0xc6   : > { %v1174_v47 = vpack.c.bf16 %v686_v45, %v685_v43  ;;  %v1214_v48 = vpack.c.bf16 %v702_v46, %v701_v44 }
  0xc8   : > { %1322 = vst [vmem:[%s1623_s10 + $0x10] sm:$0xff] %v1174_v47   ;;  %v613_v51 = vpop.f32.mrf.mxu2  ;;  %v653_v52 = vpop.f32.mrf.mxu3 }
  0xc9   : > { %1330 = vst [vmem:[%s1623_s10 + $0x50] sm:$0xff] %v1214_v48   ;;  %v614_v53 = vadd.f32 %v1612_v41, %v613_v51  ;;  %v654_v54 = vadd.f32 %v1612_v41, %v653_v52  ;;  %v536_v55 = vpop.f32.mrf.mxu0  ;;  %v576_v56 = vpop.f32.mrf.mxu1 }
  0xca   : > { %v537_v63 = vadd.f32 %v1612_v41, %v536_v55  ;;  %v577_v0 = vadd.f32 %v1612_v41, %v576_v56 }
  0xcb   : > { %v718_v59 = vmax.f32 %v614_v53, 0.0  ;;  %v734_v60 = vmax.f32 %v654_v54, 0.0 }
  0xcc   : > { %v687_v7 = vmax.f32 %v537_v63, 0.0  ;;  %v703_v8 = vmax.f32 %v577_v0, 0.0 }
  0xcd   : > { %v1254_v61 = vpack.c.bf16 %v718_v59, %v717_v57  ;;  %v1294_v62 = vpack.c.bf16 %v734_v60, %v733_v58 }
  0xcf   : > { %1338 = vst [vmem:[%s1623_s10 + $0x90] sm:$0xff] %v1254_v61  }
  0xd0   : > { %1346 = vst [vmem:[%s1623_s10 + $0xd0] sm:$0xff] %v1294_v62   ;;  %v616_v1 = vpop.f32.mrf.mxu2  ;;  %v656_v2 = vpop.f32.mrf.mxu3 }
  0xd1   : > { %v538_v3 = vpop.f32.mrf.mxu0  ;;  %v578_v4 = vpop.f32.mrf.mxu1  ;;  %v617_v13 = vadd.f32 %v1612_v41, %v616_v1  ;;  %v657_v14 = vadd.f32 %v1612_v41, %v656_v2 }
  0xd2   : > { %v539_v5 = vadd.f32 %v1612_v41, %v538_v3  ;;  %v579_v6 = vadd.f32 %v1612_v41, %v578_v4 }
  0xd3   : > { %v719_v21 = vmax.f32 %v617_v13, 0.0  ;;  %v735_v22 = vmax.f32 %v657_v14, 0.0 }
  0xd4   : > { %v688_v9 = vmax.f32 %v539_v5, 0.0  ;;  %v704_v10 = vmax.f32 %v579_v6, 0.0 }
  0xd6   : > { %v1179_v11 = vpack.c.bf16 %v688_v9, %v687_v7  ;;  %v1219_v12 = vpack.c.bf16 %v704_v10, %v703_v8 }
  0xd8   : > { %1323 = vst [vmem:[%s1623_s10 + $0x18] sm:$0xff] %v1179_v11   ;;  %v618_v15 = vpop.f32.mrf.mxu2  ;;  %v658_v16 = vpop.f32.mrf.mxu3 }
  0xd9   : > { %1331 = vst [vmem:[%s1623_s10 + $0x58] sm:$0xff] %v1219_v12   ;;  %v619_v17 = vadd.f32 %v1612_v41, %v618_v15  ;;  %v659_v18 = vadd.f32 %v1612_v41, %v658_v16  ;;  %v541_v19 = vpop.f32.mrf.mxu0  ;;  %v581_v20 = vpop.f32.mrf.mxu1 }
  0xda   : > { %v542_v27 = vadd.f32 %v1612_v41, %v541_v19  ;;  %v582_v28 = vadd.f32 %v1612_v41, %v581_v20 }
  0xdb   : > { %v720_v23 = vmax.f32 %v619_v17, 0.0  ;;  %v736_v24 = vmax.f32 %v659_v18, 0.0 }
  0xdc   : > { %v689_v35 = vmax.f32 %v542_v27, 0.0  ;;  %v705_v36 = vmax.f32 %v582_v28, 0.0 }
  0xdd   : > { %v1259_v25 = vpack.c.bf16 %v720_v23, %v719_v21  ;;  %v1299_v26 = vpack.c.bf16 %v736_v24, %v735_v22 }
  0xdf   : > { %1339 = vst [vmem:[%s1623_s10 + $0x98] sm:$0xff] %v1259_v25  }
  0xe0   : > { %1347 = vst [vmem:[%s1623_s10 + $0xd8] sm:$0xff] %v1299_v26   ;;  %v621_v29 = vpop.f32.mrf.mxu2  ;;  %v661_v30 = vpop.f32.mrf.mxu3 }
  0xe1   : > { %v543_v31 = vpop.f32.mrf.mxu0  ;;  %v583_v32 = vpop.f32.mrf.mxu1  ;;  %v622_v42 = vadd.f32 %v1612_v41, %v621_v29  ;;  %v662_v43 = vadd.f32 %v1612_v41, %v661_v30 }
  0xe2   : > { %v544_v33 = vadd.f32 %v1612_v41, %v543_v31  ;;  %v584_v34 = vadd.f32 %v1612_v41, %v583_v32 }
  0xe3   : > { %v721_v50 = vmax.f32 %v622_v42, 0.0  ;;  %v737_v51 = vmax.f32 %v662_v43, 0.0 }
  0xe4   : > { %v690_v37 = vmax.f32 %v544_v33, 0.0  ;;  %v706_v38 = vmax.f32 %v584_v34, 0.0 }
  0xe6   : > { %v1184_v39 = vpack.c.bf16 %v690_v37, %v689_v35  ;;  %v1224_v40 = vpack.c.bf16 %v706_v38, %v705_v36 }
  0xe8   : > { %1324 = vst [vmem:[%s1623_s10 + $0x20] sm:$0xff] %v1184_v39   ;;  %v623_v44 = vpop.f32.mrf.mxu2  ;;  %v663_v45 = vpop.f32.mrf.mxu3 }
  0xe9   : > { %1332 = vst [vmem:[%s1623_s10 + $0x60] sm:$0xff] %v1224_v40   ;;  %v624_v46 = vadd.f32 %v1612_v41, %v623_v44  ;;  %v664_v47 = vadd.f32 %v1612_v41, %v663_v45  ;;  %v546_v48 = vpop.f32.mrf.mxu0  ;;  %v586_v49 = vpop.f32.mrf.mxu1 }
  0xea   : > { %v547_v56 = vadd.f32 %v1612_v41, %v546_v48  ;;  %v587_v57 = vadd.f32 %v1612_v41, %v586_v49 }
  0xeb   : > { %v722_v52 = vmax.f32 %v624_v46, 0.0  ;;  %v738_v53 = vmax.f32 %v664_v47, 0.0 }
  0xec   : > { %v691_v0 = vmax.f32 %v547_v56, 0.0  ;;  %v707_v1 = vmax.f32 %v587_v57, 0.0 }
  0xed   : > { %v1264_v54 = vpack.c.bf16 %v722_v52, %v721_v50  ;;  %v1304_v55 = vpack.c.bf16 %v738_v53, %v737_v51 }
  0xef   : > { %1340 = vst [vmem:[%s1623_s10 + $0xa0] sm:$0xff] %v1264_v54  }
  0xf0   : > { %1348 = vst [vmem:[%s1623_s10 + $0xe0] sm:$0xff] %v1304_v55   ;;  %v626_v58 = vpop.f32.mrf.mxu2  ;;  %v666_v59 = vpop.f32.mrf.mxu3 }
  0xf1   : > { %v548_v60 = vpop.f32.mrf.mxu0  ;;  %v588_v61 = vpop.f32.mrf.mxu1  ;;  %v627_v6 = vadd.f32 %v1612_v41, %v626_v58  ;;  %v667_v7 = vadd.f32 %v1612_v41, %v666_v59 }
  0xf2   : > { %v549_v62 = vadd.f32 %v1612_v41, %v548_v60  ;;  %v589_v63 = vadd.f32 %v1612_v41, %v588_v61 }
  0xf3   : > { %v723_v14 = vmax.f32 %v627_v6, 0.0  ;;  %v739_v15 = vmax.f32 %v667_v7, 0.0 }
  0xf4   : > { %v692_v2 = vmax.f32 %v549_v62, 0.0  ;;  %v708_v3 = vmax.f32 %v589_v63, 0.0 }
  0xf6   : > { %v1189_v4 = vpack.c.bf16 %v692_v2, %v691_v0  ;;  %v1229_v5 = vpack.c.bf16 %v708_v3, %v707_v1 }
  0xf8   : > { %1325 = vst [vmem:[%s1623_s10 + $0x28] sm:$0xff] %v1189_v4   ;;  %v628_v8 = vpop.f32.mrf.mxu2  ;;  %v668_v9 = vpop.f32.mrf.mxu3 }
  0xf9   : > { %1333 = vst [vmem:[%s1623_s10 + $0x68] sm:$0xff] %v1229_v5   ;;  %v629_v10 = vadd.f32 %v1612_v41, %v628_v8  ;;  %v669_v11 = vadd.f32 %v1612_v41, %v668_v9  ;;  %v551_v12 = vpop.f32.mrf.mxu0  ;;  %v591_v13 = vpop.f32.mrf.mxu1 }
  0xfa   : > { %v552_v20 = vadd.f32 %v1612_v41, %v551_v12  ;;  %v592_v21 = vadd.f32 %v1612_v41, %v591_v13 }
  0xfb   : > { %v724_v16 = vmax.f32 %v629_v10, 0.0  ;;  %v740_v17 = vmax.f32 %v669_v11, 0.0 }
  0xfc   : > { %v693_v28 = vmax.f32 %v552_v20, 0.0  ;;  %v709_v29 = vmax.f32 %v592_v21, 0.0 }
  0xfd   : > { %v1269_v18 = vpack.c.bf16 %v724_v16, %v723_v14  ;;  %v1309_v19 = vpack.c.bf16 %v740_v17, %v739_v15 }
  0xff   : > { %1341 = vst [vmem:[%s1623_s10 + $0xa8] sm:$0xff] %v1269_v18  }
 0x100   : > { %1349 = vst [vmem:[%s1623_s10 + $0xe8] sm:$0xff] %v1309_v19   ;;  %v631_v22 = vpop.f32.mrf.mxu2  ;;  %v671_v23 = vpop.f32.mrf.mxu3 }
 0x101   : > { %v553_v24 = vpop.f32.mrf.mxu0  ;;  %v593_v25 = vpop.f32.mrf.mxu1  ;;  %v632_v34 = vadd.f32 %v1612_v41, %v631_v22  ;;  %v672_v35 = vadd.f32 %v1612_v41, %v671_v23 }
 0x102   : > { %v554_v26 = vadd.f32 %v1612_v41, %v553_v24  ;;  %v594_v27 = vadd.f32 %v1612_v41, %v593_v25 }
 0x103   : > { %v725_v43 = vmax.f32 %v632_v34, 0.0  ;;  %v741_v44 = vmax.f32 %v672_v35, 0.0 }
 0x104   : > { %v694_v30 = vmax.f32 %v554_v26, 0.0  ;;  %v710_v31 = vmax.f32 %v594_v27, 0.0 }
 0x106   : > { %v1194_v32 = vpack.c.bf16 %v694_v30, %v693_v28  ;;  %v1234_v33 = vpack.c.bf16 %v710_v31, %v709_v29 }
 0x108   : > { %1326 = vst [vmem:[%s1623_s10 + $0x30] sm:$0xff] %v1194_v32   ;;  %v633_v36 = vpop.f32.mrf.mxu2  ;;  %v673_v37 = vpop.f32.mrf.mxu3 }
 0x109   : > { %1334 = vst [vmem:[%s1623_s10 + $0x70] sm:$0xff] %v1234_v33   ;;  %v634_v38 = vadd.f32 %v1612_v41, %v633_v36  ;;  %v674_v39 = vadd.f32 %v1612_v41, %v673_v37  ;;  %v556_v40 = vpop.f32.mrf.mxu0  ;;  %v596_v42 = vpop.f32.mrf.mxu1 }
 0x10a   : > { %v557_v49 = vadd.f32 %v1612_v41, %v556_v40  ;;  %v597_v50 = vadd.f32 %v1612_v41, %v596_v42 }
 0x10b   : > { %v726_v45 = vmax.f32 %v634_v38, 0.0  ;;  %v742_v46 = vmax.f32 %v674_v39, 0.0 }
 0x10c   : > { %v695_v57 = vmax.f32 %v557_v49, 0.0  ;;  %v711_v58 = vmax.f32 %v597_v50, 0.0 }
 0x10d   : > { %v1274_v47 = vpack.c.bf16 %v726_v45, %v725_v43  ;;  %v1314_v48 = vpack.c.bf16 %v742_v46, %v741_v44 }
 0x10f   : > { %1342 = vst [vmem:[%s1623_s10 + $0xb0] sm:$0xff] %v1274_v47  }
 0x110   : > { %1350 = vst [vmem:[%s1623_s10 + $0xf0] sm:$0xff] %v1314_v48   ;;  %v636_v51 = vpop.f32.mrf.mxu2  ;;  %v676_v52 = vpop.f32.mrf.mxu3 }
 0x111   : > { %v558_v53 = vpop.f32.mrf.mxu0  ;;  %v598_v54 = vpop.f32.mrf.mxu1  ;;  %v637_v63 = vadd.f32 %v1612_v41, %v636_v51  ;;  %v677_v0 = vadd.f32 %v1612_v41, %v676_v52 }
 0x112   : > { %v559_v55 = vadd.f32 %v1612_v41, %v558_v53  ;;  %v599_v56 = vadd.f32 %v1612_v41, %v598_v54 }
 0x113   : > { %v727_v5 = vmax.f32 %v637_v63, 0.0  ;;  %v743_v6 = vmax.f32 %v677_v0, 0.0 }
 0x114   : > { %v696_v59 = vmax.f32 %v559_v55, 0.0  ;;  %v712_v60 = vmax.f32 %v599_v56, 0.0 }
 0x116   : > { %v1199_v61 = vpack.c.bf16 %v696_v59, %v695_v57  ;;  %v1239_v62 = vpack.c.bf16 %v712_v60, %v711_v58 }
 0x118   : > { %1327 = vst [vmem:[%s1623_s10 + $0x38] sm:$0xff] %v1199_v61   ;;  %v638_v1 = vpop.f32.mrf.mxu2  ;;  %v678_v2 = vpop.f32.mrf.mxu3 }
 0x119   : > { %1335 = vst [vmem:[%s1623_s10 + $0x78] sm:$0xff] %v1239_v62   ;;  %v639_v3 = vadd.f32 %v1612_v41, %v638_v1  ;;  %v679_v4 = vadd.f32 %v1612_v41, %v678_v2 }
 0x11b   : > { %v728_v7 = vmax.f32 %v639_v3, 0.0  ;;  %v744_v8 = vmax.f32 %v679_v4, 0.0 }
 0x11d   : > { %v1279_v9 = vpack.c.bf16 %v728_v7, %v727_v5  ;;  %v1319_v10 = vpack.c.bf16 %v744_v8, %v743_v6 }
 0x11f   : > { %1343 = vst [vmem:[%s1623_s10 + $0xb8] sm:$0xff] %v1279_v9  }
 0x120   : > { %1351 = vst [vmem:[%s1623_s10 + $0xf8] sm:$0xff] %v1319_v10  }
 0x121   : > { %1425 = shalt.err (!%p1422_p3)
}
 0x122   : > { %s1463_s6 = smov 64   ;;  %s1464_s7 = smov 4  }
 0x123   : > { %1355 = dma.vmem_to_hbm [thread:$0]  (%p1523_p5), %s887_s16, 4096, %s889_s24, %s874_s25, %s1463_s6, %s1463_s6, %s1464_s7  }
 0x124 PF: > { %p1361_p4 = scmp.ge.s32.totalorder %s1460_s15, 2  ;;  %s903_s8 = sand.u32 1, %s1448_s12  }
 0x125   : > { %s904_s9 = scalar_lea.sflag [#allocation3], %s903_s8 }
 0x126   : > { %p1358_p7 = pnand %p1361_p4, %p1527_p6 }
 0x128   : > { %p1359_p8 = pneg %p1358_p7 }
 0x12a   : > { %1443 = dma.done.wait (%p1359_p8), %s904_s9, 4096  }
 0x12b   : > { %1445 = vsyncadd (%p1359_p8), %s904_s9, 4294963200  ;;  %p13_p9 = scmp.ge.s32.totalorder %s1510_s18, 5   ;;  %s1755_s12 = smov %s1452_s13 }
 0x12c   : > { %s1756_s13 = smov %s1456_s14  ;;  %s1757_s14 = smov %s1521_s21 }
 0x12d   : > { %s1758_s15 = smov %s1510_s18  ;;  %15 = sbr.rel (!%p13_p9) target bundleno = 3 (0x3), region = 67 }
 0x132   :  { %910 = vsyncpa [#allocation3], 1 }
 0x133   :  { %912 = vsyncpa [#allocation3 + $0x1], 1 }

</bundles_post_ra>
